<compile_context>
chip_gen: v7x
topology: tpu7x:2x2x1
jax: 0.10.0
libtpu: 0.0.40
codegen_flags: <defaults>
</compile_context>

<pallas_src>
import functools

import jax
import jax.numpy as jnp
from jax.experimental import pallas as pl
from jax.experimental.pallas import tpu as pltpu

N_KEY_CLASS = 12
KDN_HIDDEN_DIMS = [32, 32]          # hps.kdn_hidden_dims

# Batch tile (sublane) size.  A bf16 input tile is TB * T*P * 2 bytes; with
# double buffering this stays far below the scoped VMEM limit on every
# generation (16 MiB v5e default .. 64 MiB v7x physical) while being large
# enough to amortize the ~0.35 us/step pipeline overhead.
_TB_MAX = 512


def _make_kernel(n_layers):
    def kernel(*refs):
        # refs: x, fold, (w1, b1), ..., (wL, bL), out
        x_ref, fold_ref = refs[0], refs[1]
        out_ref = refs[-1]
        wb_refs = refs[2:-1]

        # (TB, T*P) tile; input may be bf16/int8 — compute in f32 on-chip.
        x = x_ref[...].astype(jnp.float32)
        # time-reduction + octave fold as a single MXU contraction:
        #   (TB, T*P) @ (T*P, 12) -> (TB, 12)
        h = jnp.dot(x, fold_ref[...], preferred_element_type=jnp.float32)

        for li in range(n_layers):
            w = wb_refs[2 * li][...]                 # (d_in, d_out)
            b = wb_refs[2 * li + 1][...]             # (1, d_out)
            h = jax.nn.sigmoid(
                jnp.dot(h, w, preferred_element_type=jnp.float32) + b)

        out_ref[...] = h                             # (TB, 1)
    return kernel


@functools.partial(jax.jit, static_argnames=("n_layers",))
def _keydisc_pallas(x2d, fold, flat_params, n_layers):
    B_pad, TP = x2d.shape
    TB = min(B_pad, _TB_MAX)
    assert B_pad % TB == 0
    grid = (B_pad // TB,)

    # prbt streams over the batch grid axis (auto double-buffered); the fold
    # matrix and the tiny MLP params have constant block indices -> loaded
    # once and kept resident in VMEM across grid steps.
    x_spec = pl.BlockSpec((TB, TP), lambda i: (i, 0))
    fold_spec = pl.BlockSpec(fold.shape, lambda i: (0, 0))
    param_specs = [pl.BlockSpec(p.shape, lambda i: (0, 0)) for p in flat_params]
    out_spec = pl.BlockSpec((TB, 1), lambda i: (i, 0))

    # Advisory cost hint: the kernel is memory-bound on streaming x2d.
    mlp_flops, transcendentals, param_bytes = 0, 0, 0
    for li in range(n_layers):
        w, b = flat_params[2 * li], flat_params[2 * li + 1]
        mlp_flops += 2 * B_pad * w.shape[0] * w.shape[1]
        transcendentals += B_pad * w.shape[1]
        param_bytes += w.size * w.dtype.itemsize + b.size * b.dtype.itemsize
    cost = pl.CostEstimate(
        flops=2 * B_pad * TP * N_KEY_CLASS + mlp_flops,
        transcendentals=transcendentals,
        bytes_accessed=(x2d.size * x2d.dtype.itemsize
                        + fold.size * fold.dtype.itemsize
                        + param_bytes
                        + 4 * B_pad),
    )

    return pl.pallas_call(
        _make_kernel(n_layers),
        out_shape=jax.ShapeDtypeStruct((B_pad, 1), jnp.float32),
        grid=grid,
        in_specs=[x_spec, fold_spec] + param_specs,
        out_specs=out_spec,
        compiler_params=pltpu.CompilerParams(
            dimension_semantics=("parallel",),      # v7x: shard batch over 2 TCs
            vmem_limit_bytes=32 << 20,              # explicit, valid on v5e..v7x
        ),
        cost_estimate=cost,
    )(x2d, fold, *flat_params)


class KeyDiscNetPallas:
    """JAX/Pallas port of KeyDiscNet (deterministic synthetic weights)."""

    def __init__(self, kdn_hidden_dims, seed=0):
        hidden_dims = [N_KEY_CLASS] + list(kdn_hidden_dims) + [1]
        self.n_layers = len(hidden_dims) - 1
        key = jax.random.PRNGKey(seed)
        self.params = []
        for i in range(1, len(hidden_dims)):
            d_in, d_out = hidden_dims[i - 1], hidden_dims[i]
            key, kw, kb = jax.random.split(key, 3)
            bound = 1.0 / (d_in ** 0.5)              # mimic torch nn.Linear init
            w = jax.random.uniform(kw, (d_in, d_out), jnp.float32, -bound, bound)
            b = jax.random.uniform(kb, (1, d_out), jnp.float32, -bound, bound)
            self.params.append((w, b))
        self._flat_params = tuple(p for wb in self.params for p in wb)
        self._fold_cache = {}                        # built once per (T, P)

    def _get_fold(self, T, P):
        key = (T, P)
        if key not in self._fold_cache:
            # fold[p, k] = 1 if p % 12 == k  (octave fold), tiled over T so the
            # time-sum and octave-sum become a single (T*P, 12) contraction.
            base = (jnp.arange(P)[:, None] % N_KEY_CLASS ==
                    jnp.arange(N_KEY_CLASS)[None, :]).astype(jnp.float32)
            self._fold_cache[key] = jnp.tile(base, (T, 1))   # (T*P, 12)
        return self._fold_cache[key]

    def __call__(self, prbt):
        B, T, P = prbt.shape
        assert P % N_KEY_CLASS == 0
        fold = self._get_fold(T, P)
        # row-major (B, T, P) -> (B, T*P) is free; NO dtype cast here — the
        # kernel reads the piano roll in its native narrow dtype (bf16/int8)
        # and converts per-tile on-chip.
        x2d = prbt.reshape(B, T * P)
        if B > _TB_MAX:                              # pad batch to tile multiple
            B_pad = pl.cdiv(B, _TB_MAX) * _TB_MAX
            if B_pad != B:
                x2d = jnp.pad(x2d, ((0, B_pad - B), (0, 0)))
        out = _keydisc_pallas(x2d, fold, self._flat_params, self.n_layers)
        return jnp.squeeze(out[:B])                  # matches torch .squeeze()

    # pure-JAX reference for correctness checking
    def reference(self, prbt):
        x = prbt.astype(jnp.float32)
        B, T, P = x.shape
        feat = jnp.sum(x, axis=1).reshape(B, P // N_KEY_CLASS, N_KEY_CLASS).sum(axis=1)
        h = feat
        for (w, b) in self.params:
            h = jax.nn.sigmoid(h @ w + b)
        return jnp.squeeze(h)


if __name__ == "__main__":
    # small shapes: batch=2, time steps=8, pitch range = 4 octaves * 12 = 48
    B, T, P = 2, 8, 48
    key = jax.random.PRNGKey(0)
    k1, k2 = jax.random.split(key)
    # binary piano-roll batch tensor, shipped as bf16 (narrow HBM stream)
    prbt = (jax.random.uniform(k1, (B, T, P)) > 0.7).astype(jnp.bfloat16)

    net = KeyDiscNetPallas(KDN_HIDDEN_DIMS, seed=0)
    out = jax.block_until_ready(net(prbt))
    ref = jax.block_until_ready(net.reference(prbt))
    assert out.shape == (B,), out.shape
    assert jnp.allclose(out, ref, atol=1e-5, rtol=1e-5), (out, ref)

    # second check: exercise the gridded / batch-padded pipeline path (B > TB)
    B2 = 2 * _TB_MAX + 17
    prbt2 = (jax.random.uniform(k2, (B2, T, P)) > 0.7).astype(jnp.bfloat16)
    out2 = jax.block_until_ready(net(prbt2))
    ref2 = jax.block_until_ready(net.reference(prbt2))
    assert out2.shape == (B2,), out2.shape
    assert jnp.allclose(out2, ref2, atol=1e-5, rtol=1e-5)

    print("KERNEL_OK")
</pallas_src>

<mosaic_0001>
module attributes {stable_mosaic.version = 11 : i64} {
  func.func @kernel(%arg0: i32, %arg1: memref<2x384xbf16, #tpu.memory_space<vmem>>, %arg2: memref<384x12xf32, #tpu.memory_space<vmem>>, %arg3: memref<12x32xf32, #tpu.memory_space<vmem>>, %arg4: memref<1x32xf32, #tpu.memory_space<vmem>>, %arg5: memref<32x32xf32, #tpu.memory_space<vmem>>, %arg6: memref<1x32xf32, #tpu.memory_space<vmem>>, %arg7: memref<32x1xf32, #tpu.memory_space<vmem>>, %arg8: memref<1x1xf32, #tpu.memory_space<vmem>>, %arg9: memref<2x1xf32, #tpu.memory_space<vmem>>) attributes {dimension_semantics = [#tpu.dimension_semantics<parallel>], iteration_bounds = array<i64: 1>, scalar_prefetch = 0 : i64, scratch_operands = 0 : i64, tpu.core_type = #tpu.core_type<tc>, window_params = [{transform_indices = @transform_0, window_bounds = array<i64: 2, 384>}, {pipeline_mode = #tpu.pipeline_mode<synchronous>, transform_indices = @transform_1, window_bounds = array<i64: 384, 12>}, {pipeline_mode = #tpu.pipeline_mode<synchronous>, transform_indices = @transform_2, window_bounds = array<i64: 12, 32>}, {pipeline_mode = #tpu.pipeline_mode<synchronous>, transform_indices = @transform_3, window_bounds = array<i64: 1, 32>}, {pipeline_mode = #tpu.pipeline_mode<synchronous>, transform_indices = @transform_4, window_bounds = array<i64: 32, 32>}, {pipeline_mode = #tpu.pipeline_mode<synchronous>, transform_indices = @transform_5, window_bounds = array<i64: 1, 32>}, {pipeline_mode = #tpu.pipeline_mode<synchronous>, transform_indices = @transform_6, window_bounds = array<i64: 32, 1>}, {pipeline_mode = #tpu.pipeline_mode<synchronous>, transform_indices = @transform_7, window_bounds = array<i64: 1, 1>}, {transform_indices = @transform_8, window_bounds = array<i64: 2, 1>}]} {
    %c0 = arith.constant 0 : index
    %c0_0 = arith.constant 0 : index
    %0 = vector.load %arg1[%c0, %c0_0] : memref<2x384xbf16, #tpu.memory_space<vmem>>, vector<2x384xbf16>
    %1 = arith.extf %0 : vector<2x384xbf16> to vector<2x384xf32>
    %c0_1 = arith.constant 0 : index
    %c0_2 = arith.constant 0 : index
    %2 = vector.load %arg2[%c0_1, %c0_2] : memref<384x12xf32, #tpu.memory_space<vmem>>, vector<384x12xf32>
    %cst = arith.constant dense<0.000000e+00> : vector<2x12xf32>
    %3 = tpu.matmul %1, %2, %cst {dimension_numbers = #tpu.dot_dimension_numbers<[1], [0], [0], [1], [0, 0, 1, 1], [], []>} : vector<2x384xf32>, vector<384x12xf32>, vector<2x12xf32> -> vector<2x12xf32>
    %c0_3 = arith.constant 0 : index
    %c0_4 = arith.constant 0 : index
    %4 = vector.load %arg3[%c0_3, %c0_4] : memref<12x32xf32, #tpu.memory_space<vmem>>, vector<12x32xf32>
    %c0_5 = arith.constant 0 : index
    %c0_6 = arith.constant 0 : index
    %5 = vector.load %arg4[%c0_5, %c0_6] : memref<1x32xf32, #tpu.memory_space<vmem>>, vector<1x32xf32>
    %cst_7 = arith.constant dense<0.000000e+00> : vector<2x32xf32>
    %6 = tpu.matmul %3, %4, %cst_7 {dimension_numbers = #tpu.dot_dimension_numbers<[1], [0], [0], [1], [0, 0, 1, 1], [], []>} : vector<2x12xf32>, vector<12x32xf32>, vector<2x32xf32> -> vector<2x32xf32>
    %7 = vector.broadcast %5 : vector<1x32xf32> to vector<2x32xf32>
    %8 = arith.addf %6, %7 : vector<2x32xf32>
    %9 = arith.negf %8 : vector<2x32xf32>
    %10 = math.exp %9 : vector<2x32xf32>
    %cst_8 = arith.constant 1.000000e+00 : f32
    %11 = vector.broadcast %cst_8 : f32 to vector<2x32xf32>
    %12 = arith.addf %11, %10 : vector<2x32xf32>
    %13 = arith.divf %11, %12 : vector<2x32xf32>
    %c0_9 = arith.constant 0 : index
    %c0_10 = arith.constant 0 : index
    %14 = vector.load %arg5[%c0_9, %c0_10] : memref<32x32xf32, #tpu.memory_space<vmem>>, vector<32x32xf32>
    %c0_11 = arith.constant 0 : index
    %c0_12 = arith.constant 0 : index
    %15 = vector.load %arg6[%c0_11, %c0_12] : memref<1x32xf32, #tpu.memory_space<vmem>>, vector<1x32xf32>
    %cst_13 = arith.constant dense<0.000000e+00> : vector<2x32xf32>
    %16 = tpu.matmul %13, %14, %cst_13 {dimension_numbers = #tpu.dot_dimension_numbers<[1], [0], [0], [1], [0, 0, 1, 1], [], []>} : vector<2x32xf32>, vector<32x32xf32>, vector<2x32xf32> -> vector<2x32xf32>
    %17 = vector.broadcast %15 : vector<1x32xf32> to vector<2x32xf32>
    %18 = arith.addf %16, %17 : vector<2x32xf32>
    %19 = arith.negf %18 : vector<2x32xf32>
    %20 = math.exp %19 : vector<2x32xf32>
    %cst_14 = arith.constant 1.000000e+00 : f32
    %21 = vector.broadcast %cst_14 : f32 to vector<2x32xf32>
    %22 = arith.addf %21, %20 : vector<2x32xf32>
    %23 = arith.divf %21, %22 : vector<2x32xf32>
    %c0_15 = arith.constant 0 : index
    %c0_16 = arith.constant 0 : index
    %24 = vector.load %arg7[%c0_15, %c0_16] : memref<32x1xf32, #tpu.memory_space<vmem>>, vector<32x1xf32>
    %c0_17 = arith.constant 0 : index
    %c0_18 = arith.constant 0 : index
    %25 = vector.load %arg8[%c0_17, %c0_18] : memref<1x1xf32, #tpu.memory_space<vmem>>, vector<1x1xf32>
    %cst_19 = arith.constant dense<0.000000e+00> : vector<2x1xf32>
    %26 = tpu.matmul %23, %24, %cst_19 {dimension_numbers = #tpu.dot_dimension_numbers<[1], [0], [0], [1], [0, 0, 1, 1], [], []>} : vector<2x32xf32>, vector<32x1xf32>, vector<2x1xf32> -> vector<2x1xf32>
    %27 = vector.broadcast %25 : vector<1x1xf32> to vector<2x1xf32>
    %28 = arith.addf %26, %27 : vector<2x1xf32>
    %29 = arith.negf %28 : vector<2x1xf32>
    %30 = math.exp %29 : vector<2x1xf32>
    %cst_20 = arith.constant 1.000000e+00 : f32
    %31 = vector.broadcast %cst_20 : f32 to vector<2x1xf32>
    %32 = arith.addf %31, %30 : vector<2x1xf32>
    %33 = arith.divf %31, %32 : vector<2x1xf32>
    %c0_21 = arith.constant 0 : index
    %c0_22 = arith.constant 0 : index
    %34 = vector.load %arg9[%c0_21, %c0_22] : memref<2x1xf32, #tpu.memory_space<vmem>>, vector<2x1xf32>
    tpu.vector_store %arg9[%c0_21, %c0_22], %33 {strides = array<i32>} : memref<2x1xf32, #tpu.memory_space<vmem>>, vector<2x1xf32>,
    return
  }
  func.func @transform_0(%arg0: i32) -> (i32, i32) {
    %c0_i32 = arith.constant 0 : i32
    %c0_i32_0 = arith.constant 0 : i32
    return %arg0, %c0_i32 : i32, i32
  }
  func.func @transform_1(%arg0: i32) -> (i32, i32) {
    %c0_i32 = arith.constant 0 : i32
    %c0_i32_0 = arith.constant 0 : i32
    %c0_i32_1 = arith.constant 0 : i32
    return %c0_i32, %c0_i32_0 : i32, i32
  }
  func.func @transform_2(%arg0: i32) -> (i32, i32) {
    %c0_i32 = arith.constant 0 : i32
    %c0_i32_0 = arith.constant 0 : i32
    %c0_i32_1 = arith.constant 0 : i32
    return %c0_i32, %c0_i32_0 : i32, i32
  }
  func.func @transform_3(%arg0: i32) -> (i32, i32) {
    %c0_i32 = arith.constant 0 : i32
    %c0_i32_0 = arith.constant 0 : i32
    %c0_i32_1 = arith.constant 0 : i32
    return %c0_i32, %c0_i32_0 : i32, i32
  }
  func.func @transform_4(%arg0: i32) -> (i32, i32) {
    %c0_i32 = arith.constant 0 : i32
    %c0_i32_0 = arith.constant 0 : i32
    %c0_i32_1 = arith.constant 0 : i32
    return %c0_i32, %c0_i32_0 : i32, i32
  }
  func.func @transform_5(%arg0: i32) -> (i32, i32) {
    %c0_i32 = arith.constant 0 : i32
    %c0_i32_0 = arith.constant 0 : i32
    %c0_i32_1 = arith.constant 0 : i32
    return %c0_i32, %c0_i32_0 : i32, i32
  }
  func.func @transform_6(%arg0: i32) -> (i32, i32) {
    %c0_i32 = arith.constant 0 : i32
    %c0_i32_0 = arith.constant 0 : i32
    %c0_i32_1 = arith.constant 0 : i32
    return %c0_i32, %c0_i32_0 : i32, i32
  }
  func.func @transform_7(%arg0: i32) -> (i32, i32) {
    %c0_i32 = arith.constant 0 : i32
    %c0_i32_0 = arith.constant 0 : i32
    %c0_i32_1 = arith.constant 0 : i32
    return %c0_i32, %c0_i32_0 : i32, i32
  }
  func.func @transform_8(%arg0: i32) -> (i32, i32) {
    %c0_i32 = arith.constant 0 : i32
    %c0_i32_0 = arith.constant 0 : i32
    return %arg0, %c0_i32 : i32, i32
  }
}

</mosaic_0001>

<bundles_post_ra>
// kernel: _keydisc_pallas.1
= control target key start
LH: loop header
LB: loop body
LE: loop exit
PB: predicated region body
PF: predicated region fallthrough
CT: control target
= control target key end

     0   :  { %v749_v3 = vmov 0.0|0.0   ;;  %vm750_vm0 = vmmov 0   ;;  %v751_v8 = vmov 0.0   ;;  %v752_v29 = vmov 1983009808   ;;  %s1011_s1 = inlined_call_operand.vmem [shape: f32[384,12], index: 1, kind: input, shape index: {}]   ;;  %s1012_s0 = inlined_call_operand.vmem [shape: bf16[2,384], index: 0, kind: input, shape index: {}]   ;;  %s1013_s2 = inlined_call_operand.vmem [shape: f32[12,32], index: 2, kind: input, shape index: {}]   ;;  %s1014_s4 = inlined_call_operand.vmem [shape: f32[32,32], index: 4, kind: input, shape index: {}]   ;;  %s1015_s3 = inlined_call_operand.vmem [shape: f32[1,32], index: 3, kind: input, shape index: {}]   ;;  %s1016_s6 = inlined_call_operand.vmem [shape: f32[32,1], index: 6, kind: input, shape index: {}]   ;;  %s1017_s7 = inlined_call_operand.<no memory space> [shape: f32[1,1], index: 7, kind: input, shape index: {}]   ;;  %s1018_s5 = inlined_call_operand.vmem [shape: f32[1,32], index: 5, kind: input, shape index: {}]   ;;  %s1019_s8 = inlined_call_operand.vmem [shape: f32[2,1], index: 8, kind: output, shape index: {}]  }
   0x1   :  { %v49_v0 = vld [vmem:[%s1011_s1 + $0x80] sm:$0xff]  ;;  %v50_v1 = vld [vmem:[%s1011_s1 + $0x88] sm:$0xff]  ;;  %692 = vmatprep.subr.bf16.mxu1 %v749_v3  ;;  %628 = vmatprep.mubr.msk.f32.mxu1 %vm750_vm0, %v751_v8  ;;  %v51_v11 = vld [vmem:[%s1011_s1 + $0x90] sm:$0xff]  ;;  %v84_v30 = vunpack.c.l.s4 %v752_v29  ;;  %v86_v31 = vlaneseq  ;;  %vm254_vm1 = vcmask 1043456   ;;  %vm753_vm2 = vmmov 1  }
   0x2   :  { %v33_v2 = vld [vmem:[%s1011_s1] sm:$0xff]  ;;  %v660_v4 = vpack.c.bf16 %v50_v1, %v49_v0  ;;  %v34_v5 = vld [vmem:[%s1011_s1 + $0x8] sm:$0xff]  ;;  %v52_v12 = vld [vmem:[%s1011_s1 + $0x98] sm:$0xff]  ;;  %vm250_vm4 = vcmask 97280   ;;  %vm345_vm5 = vcmask 261120   ;;  %vm515_vm6 = vcmask 1024  }
   0x3   :  { %v65_v6 = vld [vmem:[%s1011_s1 + $0x100] sm:$0xff]  ;;  %v66_v7 = vld [vmem:[%s1011_s1 + $0x108] sm:$0xff]  ;;  %v662_v9 = vpack.c.bf16 %v34_v5, %v33_v2  ;;  %v35_v13 = vld [vmem:[%s1011_s1 + $0x10] sm:$0xff]  ;;  %v664_v14 = vpack.c.bf16 %v52_v12, %v51_v11  ;;  %v85_v41 = vunpack.c.0.s8 %v84_v30  ;;  %v87_v42 = vshrl.u32 %v86_v31, 7 }
   0x4   :  { %v693_v10 = vpack.c.bf16 %v66_v7, %v65_v6  ;;  %661 = vmatprep.subr.bf16.mxu0 %v660_v4  ;;  %v36_v15 = vld [vmem:[%s1011_s1 + $0x18] sm:$0xff]  ;;  %v67_v16 = vld [vmem:[%s1011_s1 + $0x110] sm:$0xff]  ;;  %v53_v20 = vld [vmem:[%s1011_s1 + $0xa0] sm:$0xff] }
   0x5   :  { %v68_v17 = vld [vmem:[%s1011_s1 + $0x118] sm:$0xff]  ;;  %663 = vmatpush3.bf16.msra.mxu0 %v662_v9  ;;  %v666_v18 = vpack.c.bf16 %v36_v15, %v35_v13  ;;  %v54_v21 = vld [vmem:[%s1011_s1 + $0xa8] sm:$0xff]  ;;  %v37_v22 = vld [vmem:[%s1011_s1 + $0x20] sm:$0xff]  ;;  %v88_v52 = vsub.s32 %v85_v41, %v87_v42 }
   0x6   :  { %694 = vmatpush3.bf16.msra.mxu1 %v693_v10  ;;  %v696_v19 = vpack.c.bf16 %v68_v17, %v67_v16  ;;  %665 = vmatprep.subr.bf16.mxu0 %v664_v14  ;;  %v668_v23 = vpack.c.bf16 %v54_v21, %v53_v20  ;;  %v38_v24 = vld [vmem:[%s1011_s1 + $0x28] sm:$0xff]  ;;  %v69_v25 = vld [vmem:[%s1011_s1 + $0x120] sm:$0xff]  ;;  %v55_v27 = vld [vmem:[%s1011_s1 + $0xb0] sm:$0xff] }
   0x7   :  { %695 = vmatprep.subr.bf16.mxu1 %v749_v3  ;;  %v70_v26 = vld [vmem:[%s1011_s1 + $0x128] sm:$0xff]  ;;  %v56_v28 = vld [vmem:[%s1011_s1 + $0xb8] sm:$0xff]  ;;  %v670_v32 = vpack.c.bf16 %v38_v24, %v37_v22  ;;  %v39_v34 = vld [vmem:[%s1011_s1 + $0x30] sm:$0xff] }
   0x8   :  { %v699_v33 = vpack.c.bf16 %v70_v26, %v69_v25  ;;  %v672_v35 = vpack.c.bf16 %v56_v28, %v55_v27  ;;  %v40_v36 = vld [vmem:[%s1011_s1 + $0x38] sm:$0xff]  ;;  %v71_v37 = vld [vmem:[%s1011_s1 + $0x130] sm:$0xff]  ;;  %v57_v39 = vld [vmem:[%s1011_s1 + $0xc0] sm:$0xff] }
   0x9   :  { %667 = vmatpush3.bf16.msra.mxu0 %v666_v18  ;;  %v72_v38 = vld [vmem:[%s1011_s1 + $0x138] sm:$0xff]  ;;  %v58_v40 = vld [vmem:[%s1011_s1 + $0xc8] sm:$0xff]  ;;  %v674_v43 = vpack.c.bf16 %v40_v36, %v39_v34  ;;  %v41_v45 = vld [vmem:[%s1011_s1 + $0x40] sm:$0xff] }
   0xa   :  { %697 = vmatpush3.bf16.msra.mxu1 %v696_v19  ;;  %669 = vmatprep.subr.bf16.mxu0 %v668_v23  ;;  %v702_v44 = vpack.c.bf16 %v72_v38, %v71_v37  ;;  %v676_v46 = vpack.c.bf16 %v58_v40, %v57_v39  ;;  %v42_v47 = vld [vmem:[%s1011_s1 + $0x48] sm:$0xff]  ;;  %v73_v48 = vld [vmem:[%s1011_s1 + $0x140] sm:$0xff]  ;;  %v59_v50 = vld [vmem:[%s1011_s1 + $0xd0] sm:$0xff] }
   0xb   :  { %698 = vmatprep.subr.bf16.mxu1 %v749_v3  ;;  %v74_v49 = vld [vmem:[%s1011_s1 + $0x148] sm:$0xff]  ;;  %v60_v51 = vld [vmem:[%s1011_s1 + $0xd8] sm:$0xff]  ;;  %v31_v53 = vld [vmem:[%s1012_s0] sm:$0x7]  ;;  %v678_v54 = vpack.c.bf16 %v42_v47, %v41_v45 }
   0xc   :  { %v705_v55 = vpack.c.bf16 %v74_v49, %v73_v48  ;;  %v43_v56 = vld [vmem:[%s1011_s1 + $0x50] sm:$0xff]  ;;  %v32_v57 = vunpack.c.l.bf16 %v31_v53  ;;  %v680_v58 = vpack.c.bf16 %v60_v51, %v59_v50  ;;  %v44_v59 = vld [vmem:[%s1011_s1 + $0x58] sm:$0xff]  ;;  %v61_v62 = vld [vmem:[%s1011_s1 + $0xe0] sm:$0xff] }
   0xd   :  { %671 = vmatpush3.bf16.msra.mxu0 %v670_v32  ;;  %v75_v60 = vld [vmem:[%s1011_s1 + $0x150] sm:$0xff]  ;;  %v76_v61 = vld [vmem:[%s1011_s1 + $0x158] sm:$0xff]  ;;  %v62_v63 = vld [vmem:[%s1011_s1 + $0xe8] sm:$0xff]  ;;  %v682_v1 = vpack.c.bf16 %v44_v59, %v43_v56 }
   0xe   :  { %700 = vmatpush3.bf16.msra.mxu1 %v699_v33  ;;  %673 = vmatprep.subr.bf16.mxu0 %v672_v35  ;;  %v89_v0 = vrot.slane %v32_v57, %v88_v52  ;;  %v708_v2 = vpack.c.bf16 %v76_v61, %v75_v60  ;;  %v45_v4 = vld [vmem:[%s1011_s1 + $0x60] sm:$0xff]  ;;  %v684_v6 = vpack.c.bf16 %v62_v63, %v61_v62  ;;  %v46_v7 = vld [vmem:[%s1011_s1 + $0x68] sm:$0xff]  ;;  %v63_v11 = vld [vmem:[%s1011_s1 + $0xf0] sm:$0xff] }
   0xf   :  { %701 = vmatprep.subr.bf16.mxu1 %v749_v3  ;;  %v77_v9 = vld [vmem:[%s1011_s1 + $0x160] sm:$0xff]  ;;  %v78_v10 = vld [vmem:[%s1011_s1 + $0x168] sm:$0xff]  ;;  %v64_v12 = vld [vmem:[%s1011_s1 + $0xf8] sm:$0xff]  ;;  %v686_v13 = vpack.c.bf16 %v46_v7, %v45_v4  ;;  %v82_v20 = vcombine.high %v32_v57, %v32_v57 }
  0x10   :  { %v97_v5 = vcombine.high %v89_v0, %v89_v0  ;;  %v711_v14 = vpack.c.bf16 %v78_v10, %v77_v9  ;;  %v47_v15 = vld [vmem:[%s1011_s1 + $0x70] sm:$0xff]  ;;  %v688_v16 = vpack.c.bf16 %v64_v12, %v63_v11  ;;  %v48_v17 = vld [vmem:[%s1011_s1 + $0x78] sm:$0xff]  ;;  %v241_v24 = vld [vmem:[%s1013_s2] sm:$0xff] }
  0x11   :  { %675 = vmatpush3.bf16.msra.mxu0 %v674_v43  ;;  %v79_v18 = vld [vmem:[%s1011_s1 + $0x170] sm:$0xff]  ;;  %v80_v19 = vld [vmem:[%s1011_s1 + $0x178] sm:$0xff]  ;;  %v690_v21 = vpack.c.bf16 %v48_v17, %v47_v15  ;;  %v96_v23 = vrot.slane %v82_v20, %v88_v52  ;;  %v242_v25 = vld [vmem:[%s1013_s2 + $0x8] sm:$0xf]  ;;  %v13_v52 = vstv %s1017_s7 }
  0x12   :  { %703 = vmatpush3.bf16.msra.mxu1 %v702_v44  ;;  %677 = vmatprep.subr.bf16.mxu0 %v676_v46  ;;  %v714_v22 = vpack.c.bf16 %v80_v19, %v79_v18  ;;  %v717_v26 = vpack.c.bf16 %v242_v25, %v241_v24  ;;  %vm718_vm3 = vmpackc.low %vm254_vm1, %vm753_vm2  ;;  %v334_v33 = vld [vmem:[%s1014_s4] sm:$0xff]  ;;  %v335_v34 = vld [vmem:[%s1014_s4 + $0x8] sm:$0xff]  ;;  %14 = vst [vmem:[#allocation2] sm:$0x1] %v13_v52 }
  0x13   :  { %704 = vmatprep.subr.bf16.mxu1 %v749_v3  ;;  %165 = vmatprep.mubr.f32.mxu0 %v97_v5  ;;  %v336_v35 = vld [vmem:[%s1014_s4 + $0x10] sm:$0xff]  ;;  %v721_v36 = vpack.c.bf16 %v335_v34, %v334_v33  ;;  %v337_v37 = vld [vmem:[%s1014_s4 + $0x18] sm:$0xff]  ;;  %v425_v46 = vld [vmem:[%s1016_s6] sm:$0xff] }
  0x14   :  { %v724_v38 = vpack.c.bf16 %v337_v37, %v336_v35  ;;  %v426_v47 = vld [vmem:[%s1016_s6 + $0x8] sm:$0xff]  ;;  %v427_v48 = vld [vmem:[%s1016_s6 + $0x10] sm:$0xff]  ;;  %v428_v50 = vld [vmem:[%s1016_s6 + $0x18] sm:$0xff] }
  0x15   :  { %679 = vmatpush3.bf16.msra.mxu0 %v678_v54  ;;  %v727_v49 = vpack.c.bf16 %v426_v47, %v425_v46  ;;  %v730_v51 = vpack.c.bf16 %v428_v50, %v427_v48  ;;  %v525_v53 = vld [vmem:[%s1018_s5] ss:$0 sm:$0xff] }
  0x16   :  { %706 = vmatpush3.bf16.msra.mxu1 %v705_v55  ;;  %681 = vmatprep.subr.bf16.mxu0 %v680_v58 }
  0x17   :  { %707 = vmatprep.subr.bf16.mxu1 %v749_v3 }
  0x19   :  { %683 = vmatpush3.bf16.msra.mxu0 %v682_v1 }
  0x1a   :  { %709 = vmatpush3.bf16.msra.mxu1 %v708_v2  ;;  %685 = vmatprep.subr.bf16.mxu0 %v684_v6 }
  0x1b   :  { %710 = vmatprep.subr.bf16.mxu1 %v749_v3 }
  0x1d   :  { %687 = vmatpush3.bf16.msra.mxu0 %v686_v13 }
  0x1e   :  { %712 = vmatpush3.bf16.msra.mxu1 %v711_v14  ;;  %689 = vmatprep.subr.bf16.mxu0 %v688_v16 }
  0x1f   :  { %713 = vmatprep.subr.bf16.mxu1 %v749_v3 }
  0x21   :  { %691 = vmatpush3.bf16.msra.mxu0 %v690_v21 }
  0x22   :  { %715 = vmatpush3.bf16.msra.mxu1 %v714_v22  ;;  %716 = vmatprep.subr.bf16.mxu0 %v749_v3 }
  0x23   :  { %720 = vmatprep.subr.bf16.mxu1 %v749_v3 }
  0x24   :  { %166 = vmatmul.mubr.f32.vlgmr.msra.gmra.mrb[0].mxu0 %v89_v0 }
  0x25   :  { %629 = vmatmul.mubr.f32.vlgmr.msra.gmra.mrb[0].mxu1 %v96_v23  ;;  %635 = vmatprep.mubr.msk.f32.mxu0 %vm750_vm0, %v751_v8 }
  0x26   :  { %646 = vmatprep.mubr.msk.f32.mxu1 %vm750_vm0, %v751_v8  ;;  %719 = vmatpush3.bf16.msk.msra.mxu0 %vm718_vm3, %v717_v26 }
  0x27   :  { %726 = vmatprep.subr.bf16.mxu0 %v749_v3  ;;  %722 = vmatpush3.bf16.msra.mxu1 %v721_v36 }
  0x28   :  { %723 = vmatprep.subr.bf16.mxu1 %v749_v3 }
  0x2b   :  { %725 = vmatpush3.bf16.msra.mxu1 %v724_v38 }
  0xf7   :  { %v563_v27 = vpop.f32.mrb[0].mxu0 }
  0xf8   :  { %v237_v28 = vpop.f32.mrb[0].mxu1  ;;  %v564_v29 = vpop.f32.mrb[1].mxu0 }
  0xf9   :  { %v630_v30 = vpop.f32.mrb[1].mxu1  ;;  %v565_v31 = vadd.f32 %v564_v29, %v563_v27 }
  0xfb   :  { %v238_v32 = vadd.f32 %v565_v31, %v237_v28 }
  0xfd   :  { %636 = vmatmul.mubr.msk.f32.vlgmr.msra.gmra.mrb[2].mxu0 %vm250_vm4, %v238_v32 }
  0xfe   :  { %657 = vmatprep.mubr.msk.f32.mxu0 %vm750_vm0, %v751_v8  ;;  %v521_v8 = vld [vmem:[%s1015_s3] ss:$0 sm:$0xff]  ;;  %728 = vmatpush3.bf16.msra.mxu0 %v727_v49 }
  0xff   :  { %729 = vmatprep.subr.bf16.mxu0 %v749_v3  ;;  %v528_v3 = vld [vmem:[#allocation2] ss:$0 sm:$0xff] }
 0x102   :  { %731 = vmatpush3.bf16.msra.mxu0 %v730_v51 }
 0x1d0   :  { %v324_v39 = vpop.f32.mrb[2].mxu0 }
 0x1d1   :  { %v325_v40 = vadd.f32 %v521_v8, %v324_v39  ;;  %v637_v41 = vpop.f32.mrb[3].mxu0 }
 0x1d3   :  { %v524_v42 = vmul.f32 -1.442695, %v325_v40 }
 0x1d5   :  { %737 = vpow2.f32 %v524_v42 }
 0x1df   :  { %v738_v43 = vpop.eup %737 }
 0x1e0   :  { %v331_v44 = vadd.f32 1.0, %v738_v43 }
 0x1e2   :  { %739 = vrcp.f32 %v331_v44 }
 0x1ec   :  { %v740_v45 = vpop.eup %739 }
 0x1ed   :  { %647 = vmatmul.mubr.msk.f32.vlgmr.msra.gmra.mrb[2].mxu1 %vm345_vm5, %v740_v45 }
 0x2c0   :  { %v415_v54 = vpop.f32.mrb[2].mxu1 }
 0x2c1   :  { %v416_v55 = vadd.f32 %v525_v53, %v415_v54  ;;  %v648_v56 = vpop.f32.mrb[3].mxu1 }
 0x2c3   :  { %v527_v57 = vmul.f32 -1.442695, %v416_v55 }
 0x2c5   :  { %741 = vpow2.f32 %v527_v57 }
 0x2cf   :  { %v742_v58 = vpop.eup %741 }
 0x2d0   :  { %v422_v59 = vadd.f32 1.0, %v742_v58 }
 0x2d2   :  { %743 = vrcp.f32 %v422_v59 }
 0x2dc   :  { %v744_v60 = vpop.eup %743 }
 0x2dd   :  { %658 = vmatmul.mubr.msk.f32.vlgmr.msra.gmra.mrb[4].mxu0 %vm345_vm5, %v744_v60 }
 0x3b0   :  { %v505_v61 = vpop.f32.mrb[4].mxu0 }
 0x3b1   :  { %v506_v62 = vadd.f32 %v528_v3, %v505_v61  ;;  %v659_v63 = vpop.f32.mrb[5].mxu0 }
 0x3b3   :  { %v530_v0 = vmul.f32 -1.442695, %v506_v62 }
 0x3b5   :  { %745 = vpow2.f32 %v530_v0 }
 0x3bf   :  { %v746_v1 = vpop.eup %745 }
 0x3c0   :  { %v512_v2 = vadd.f32 1.0, %v746_v1 }
 0x3c2   :  { %747 = vrcp.f32 %v512_v2 }
 0x3cc   :  { %v748_v4 = vpop.eup %747 }
 0x3cd   :  { %516 = vst.msk [vmem:[%s1019_s8] sm:$0x3] %vm515_vm6, %v748_v4 }

</bundles_post_ra>
